<compile_context>
chip_gen: v7x
topology: tpu7x:2x2x1
jax: 0.10.0
libtpu: 0.0.40
codegen_flags: <defaults>
</compile_context>

<pallas_src>
import jax
import jax.numpy as jnp
from jax.experimental import pallas as pl
from jax.experimental.pallas import tpu as pltpu


# ---------------------------------------------------------------------------
# Kernel
# ---------------------------------------------------------------------------

def _adapter_kernel(x_ref, w1_ref, w2_ref, o_ref):
    """Fused relu(relu(x @ W1) @ W2) on one row tile.

    x_ref : (tile_n, c_in)
    w1_ref: (c_in, hidden)   -- resident (constant index_map)
    w2_ref: (hidden, c_in)   -- resident (constant index_map)
    o_ref : (tile_n, c_in)
    """
    h = jnp.dot(x_ref[...], w1_ref[...], preferred_element_type=jnp.float32)
    h = jnp.maximum(h, 0.0)                                    # ReLU #1
    # For bf16 weights this intentionally feeds a bf16 intermediate to the
    # second MXU pass (standard mixed-precision inference); it is an exact
    # no-op for f32 weights.
    y = jnp.dot(h.astype(w2_ref.dtype), w2_ref[...],
                preferred_element_type=jnp.float32)
    o_ref[...] = jnp.maximum(y, 0.0).astype(o_ref.dtype)       # ReLU #2


# ---------------------------------------------------------------------------
# Helpers
# ---------------------------------------------------------------------------

def _round_up(a, m):
    return ((a + m - 1) // m) * m


def _cdiv(a, b):
    return -(-a // b)


def _vmem_capacity_bytes():
    try:
        return int(pltpu.get_tpu_info().vmem_capacity_bytes)
    except Exception:
        return 64 * 1024 * 1024          # conservative (v7x-sized) fallback


def _vmem_budget_bytes():
    # Working-set budget for the pipelined tiles: ~40% of physical VMEM
    # (~25 MiB on v7x's 64 MiB parts, ~51 MiB on v5e/v6e).
    return max(int(_vmem_capacity_bytes() * 0.4), 8 * 1024 * 1024)


def _vmem_limit_bytes():
    # Scoped-VMEM limit handed to Mosaic (defaults are only 16/32 MiB).
    return int(min(_vmem_capacity_bytes() * 3 // 4, 100 * 1024 * 1024))


# ---------------------------------------------------------------------------
# Public wrapper
# ---------------------------------------------------------------------------

def adapter_forward(x, w1, w2, *, tile_n=None):
    """x: (..., c_in); w1: (c_in, hidden); w2: (hidden, c_in)."""
    c_in = x.shape[-1]
    hidden = w1.shape[1]
    assert w1.shape == (c_in, hidden), (w1.shape, (c_in, hidden))
    assert w2.shape == (hidden, c_in), (w2.shape, (hidden, c_in))

    lead = x.shape[:-1]
    x2d = x.reshape(-1, c_in)          # pure metadata reshape, no HBM pass
    n = x2d.shape[0]
    itemsize = jnp.dtype(x.dtype).itemsize

    # ---- row-tile size from the chip's VMEM capacity ----------------------
    if tile_n is None:
        # x tile + out tile, double-buffered (4x), plus the f32 h / y
        # intermediates; resident weights (double-buffered) come off the top.
        w_bytes = 2 * 2 * c_in * hidden * itemsize
        per_row = 4 * c_in * itemsize + (hidden + c_in) * 4
        budget = max(_vmem_budget_bytes() - w_bytes, 1 << 20)
        tile_n = budget // max(per_row, 1)
        tile_n = int(max(256, min((tile_n // 8) * 8, 4096)))

    # Keep >= 2 grid steps when there is enough work so the "parallel" row
    # axis actually shards across v7x's two TensorCores.
    if n >= 512:
        tile_n = min(tile_n, _round_up(_cdiv(n, 2), 8))

    if tile_n >= n:
        tile_n = n                       # block dim == full dim: any n is legal
    else:
        tile_n = max(8, (tile_n // 8) * 8)   # sublane-aligned row tiles

    grid = _cdiv(n, tile_n)              # partial tail block -> masked writeback

    cost = pl.CostEstimate(
        flops=2 * 2 * n * c_in * hidden,
        transcendentals=0,
        bytes_accessed=(2 * n * c_in + 2 * c_in * hidden) * itemsize)

    out2d = pl.pallas_call(
        _adapter_kernel,
        out_shape=jax.ShapeDtypeStruct((n, c_in), x.dtype),
        grid_spec=pltpu.PrefetchScalarGridSpec(
            num_scalar_prefetch=0,
            grid=(grid,),
            in_specs=[
                pl.BlockSpec((tile_n, c_in), lambda i: (i, 0)),
                pl.BlockSpec((c_in, hidden), lambda i: (0, 0)),   # resident
                pl.BlockSpec((hidden, c_in), lambda i: (0, 0)),   # resident
            ],
            out_specs=pl.BlockSpec((tile_n, c_in), lambda i: (i, 0)),
        ),
        compiler_params=pltpu.CompilerParams(
            dimension_semantics=("parallel",),
            vmem_limit_bytes=_vmem_limit_bytes()),
        cost_estimate=cost,
    )(x2d, w1, w2)

    return out2d.reshape(*lead, c_in)


def adapter_ref(x, w1, w2):
    h = jnp.maximum(x @ w1, 0.0)
    return jnp.maximum(h @ w2, 0.0)


# ---------------------------------------------------------------------------
# Self-test
# ---------------------------------------------------------------------------

if __name__ == "__main__":
    key = jax.random.PRNGKey(0)
    k_x, k_w1, k_w2 = jax.random.split(key, 3)

    # Small shapes consistent with Adapter(c_in=32, reduction=4).
    batch, seq, c_in, reduction = 2, 8, 32, 4
    hidden = c_in // reduction

    x = jax.random.normal(k_x, (batch, seq, c_in), dtype=jnp.float32)
    bound1 = 1.0 / (c_in ** 0.5)
    bound2 = 1.0 / (hidden ** 0.5)
    # PyTorch stores (out, in); we store the transposed "math" layout.
    w1 = jax.random.uniform(k_w1, (c_in, hidden), jnp.float32, -bound1, bound1)
    w2 = jax.random.uniform(k_w2, (hidden, c_in), jnp.float32, -bound2, bound2)

    y = jax.block_until_ready(adapter_forward(x, w1, w2))
    y_ref = adapter_ref(x, w1, w2)
    assert y.shape == x.shape
    assert jnp.allclose(y, y_ref, atol=1e-4, rtol=1e-4), "small c_in mismatch"

    # Larger feature dim (c_in = 128, reduction = 4).
    c_in2, red2 = 128, 4
    hid2 = c_in2 // red2
    k_x2, k_a, k_b = jax.random.split(jax.random.PRNGKey(1), 3)
    x2 = jax.random.normal(k_x2, (batch, seq, c_in2), dtype=jnp.float32)
    w1b = jax.random.uniform(k_a, (c_in2, hid2), jnp.float32,
                             -1.0 / c_in2 ** 0.5, 1.0 / c_in2 ** 0.5)
    w2b = jax.random.uniform(k_b, (hid2, c_in2), jnp.float32,
                             -1.0 / hid2 ** 0.5, 1.0 / hid2 ** 0.5)
    y2 = jax.block_until_ready(adapter_forward(x2, w1b, w2b))
    y2_ref = adapter_ref(x2, w1b, w2b)
    assert y2.shape == x2.shape
    assert jnp.allclose(y2, y2_ref, atol=1e-4, rtol=1e-4), "c_in=128 mismatch"

    # Ragged tail: n = 20 rows with an explicit 8-row tile -> grid of 3 with a
    # masked partial last block (exercises the no-pad / no-slice path).
    k_x3 = jax.random.PRNGKey(2)
    x3 = jax.random.normal(k_x3, (4, 5, c_in), dtype=jnp.float32)
    y3 = jax.block_until_ready(adapter_forward(x3, w1, w2, tile_n=8))
    y3_ref = adapter_ref(x3, w1, w2)
    assert y3.shape == x3.shape
    assert jnp.allclose(y3, y3_ref, atol=1e-4, rtol=1e-4), "ragged-tail mismatch"

    print("KERNEL_OK")
</pallas_src>

<mosaic_0001>
module attributes {stable_mosaic.version = 11 : i64} {
  func.func @_adapter_kernel(%arg0: i32, %arg1: memref<16x32xf32, #tpu.memory_space<vmem>>, %arg2: memref<32x8xf32, #tpu.memory_space<vmem>>, %arg3: memref<8x32xf32, #tpu.memory_space<vmem>>, %arg4: memref<16x32xf32, #tpu.memory_space<vmem>>) attributes {dimension_semantics = [#tpu.dimension_semantics<parallel>], iteration_bounds = array<i64: 1>, scalar_prefetch = 0 : i64, scratch_operands = 0 : i64, tpu.core_type = #tpu.core_type<tc>, window_params = [{transform_indices = @transform_0, window_bounds = array<i64: 16, 32>}, {pipeline_mode = #tpu.pipeline_mode<synchronous>, transform_indices = @transform_1, window_bounds = array<i64: 32, 8>}, {pipeline_mode = #tpu.pipeline_mode<synchronous>, transform_indices = @transform_2, window_bounds = array<i64: 8, 32>}, {transform_indices = @transform_3, window_bounds = array<i64: 16, 32>}]} {
    %c0 = arith.constant 0 : index
    %c0_0 = arith.constant 0 : index
    %0 = vector.load %arg1[%c0, %c0_0] : memref<16x32xf32, #tpu.memory_space<vmem>>, vector<16x32xf32>
    %c0_1 = arith.constant 0 : index
    %c0_2 = arith.constant 0 : index
    %1 = vector.load %arg2[%c0_1, %c0_2] : memref<32x8xf32, #tpu.memory_space<vmem>>, vector<32x8xf32>
    %cst = arith.constant dense<0.000000e+00> : vector<16x8xf32>
    %2 = tpu.matmul %0, %1, %cst {dimension_numbers = #tpu.dot_dimension_numbers<[1], [0], [0], [1], [0, 0, 1, 1], [], []>} : vector<16x32xf32>, vector<32x8xf32>, vector<16x8xf32> -> vector<16x8xf32>
    %cst_3 = arith.constant 0.000000e+00 : f32
    %3 = vector.broadcast %cst_3 : f32 to vector<16x8xf32>
    %4 = arith.maximumf %2, %3 : vector<16x8xf32>
    %c0_4 = arith.constant 0 : index
    %c0_5 = arith.constant 0 : index
    %5 = vector.load %arg3[%c0_4, %c0_5] : memref<8x32xf32, #tpu.memory_space<vmem>>, vector<8x32xf32>
    %cst_6 = arith.constant dense<0.000000e+00> : vector<16x32xf32>
    %6 = tpu.matmul %4, %5, %cst_6 {dimension_numbers = #tpu.dot_dimension_numbers<[1], [0], [0], [1], [0, 0, 1, 1], [], []>} : vector<16x8xf32>, vector<8x32xf32>, vector<16x32xf32> -> vector<16x32xf32>
    %cst_7 = arith.constant 0.000000e+00 : f32
    %7 = vector.broadcast %cst_7 : f32 to vector<16x32xf32>
    %8 = arith.maximumf %6, %7 : vector<16x32xf32>
    %c0_8 = arith.constant 0 : index
    %c0_9 = arith.constant 0 : index
    %9 = vector.load %arg4[%c0_8, %c0_9] : memref<16x32xf32, #tpu.memory_space<vmem>>, vector<16x32xf32>
    tpu.vector_store %arg4[%c0_8, %c0_9], %8 {strides = array<i32>} : memref<16x32xf32, #tpu.memory_space<vmem>>, vector<16x32xf32>,
    return
  }
  func.func @transform_0(%arg0: i32) -> (i32, i32) {
    %c0_i32 = arith.constant 0 : i32
    %c0_i32_0 = arith.constant 0 : i32
    return %arg0, %c0_i32 : i32, i32
  }
  func.func @transform_1(%arg0: i32) -> (i32, i32) {
    %c0_i32 = arith.constant 0 : i32
    %c0_i32_0 = arith.constant 0 : i32
    %c0_i32_1 = arith.constant 0 : i32
    return %c0_i32, %c0_i32_0 : i32, i32
  }
  func.func @transform_2(%arg0: i32) -> (i32, i32) {
    %c0_i32 = arith.constant 0 : i32
    %c0_i32_0 = arith.constant 0 : i32
    %c0_i32_1 = arith.constant 0 : i32
    return %c0_i32, %c0_i32_0 : i32, i32
  }
  func.func @transform_3(%arg0: i32) -> (i32, i32) {
    %c0_i32 = arith.constant 0 : i32
    %c0_i32_0 = arith.constant 0 : i32
    return %arg0, %c0_i32 : i32, i32
  }
}

</mosaic_0001>

<bundles_post_ra>
// kernel: tpu_custom_call.1
= control target key start
LH: loop header
LB: loop body
LE: loop exit
PB: predicated region body
PF: predicated region fallthrough
CT: control target
= control target key end

     0   :  { %vm21_vm0 = vcmask 261120   ;;  %s332_s0 = inlined_call_operand.vmem [shape: f32[16,32], index: 0, kind: input, shape index: {}]   ;;  %s333_s1 = inlined_call_operand.vmem [shape: f32[32,8], index: 1, kind: input, shape index: {}]   ;;  %s334_s2 = inlined_call_operand.vmem [shape: f32[8,32], index: 2, kind: input, shape index: {}]   ;;  %s335_s3 = inlined_call_operand.hbm [shape: f32[16,32], index: 3, kind: output, shape index: {}]  }
   0x1   :  { %v17_v0 = vld [vmem:[%s333_s1] sm:$0xff]  ;;  %v18_v1 = vld [vmem:[%s333_s1 + $0x8] sm:$0xff]  ;;  %v19_v2 = vld [vmem:[%s333_s1 + $0x10] sm:$0xff] }
   0x2   :  { %v237_v3 = vpack.c.bf16 %v18_v1, %v17_v0  ;;  %v20_v4 = vld [vmem:[%s333_s1 + $0x18] sm:$0xff]  ;;  %v15_v5 = vld [vmem:[%s332_s0] sm:$0xff] }
   0x3   :  { %v241_v6 = vpack.c.bf16 %v20_v4, %v19_v2  ;;  %229 = vmatprep.mubr.msk.f32.mxu0 %vm21_vm0, %v15_v5 }
   0x4   :  { %8 = vsyncpa [#allocation3], 0  ;;  %238 = vmatprep.subr.bf16.mxu0 %v237_v3  ;;  %v16_v7 = vld [vmem:[%s332_s0 + $0x8] sm:$0xff]  ;;  %v105_v8 = vld [vmem:[%s334_s2] sm:$0xff]  ;;  %vm106_vm1 = vcmask 64512   ;;  %s272_s25 = smov [#allocation2]  }
   0x5   :  { %240 = vmatpush3.bf16.msra.mxu0 %v237_v3  ;;  %232 = vmatprep.subr.mxu1 %v105_v8  ;;  %s197_s26 = sshll.u32 %s272_s25, 4  ;;  %s198_s26 = int_to_ptr.vmem [resolvable:$true] %s197_s26 }
   0x6   :  { %242 = vmatprep.subr.bf16.mxu0 %v241_v6  ;;  %233 = vmatpush3.msra.mxu1 %v105_v8  ;;  %s248_s0 = scalar_lea.vmem %s198_s26, 256  ;;  %p253_p1 = scmp.lt.s32.totalorder %s198_s26, %s198_s26 }
   0x7   :  { %p249_p0 = scmp.ne.s32.totalorder %s198_s26, %s248_s0  ;;  %p254_p2 = scmp.lt.s32.totalorder %s248_s0, %s248_s0 }
   0x9   :  { %244 = vmatpush3.bf16.msra.mxu0 %v241_v6  ;;  %p255_p3 = por %p254_p2, %p253_p1 }
   0xb   :  { %p256_p4 = pnand %p255_p3, %p249_p0 }
   0xc   :  { %230 = vmatmul.mubr.msk.f32.vlgmr.msra.gmra.mrb[0].mxu0 %vm21_vm0, %v16_v7 }
  0xdf   :  { %v231_v9 = vpop.f32.mrb[0].mxu0 }
  0xe0   :  { %v94_v10 = vpop.f32.mrb[1].mxu0  ;;  %v104_v12 = vmax.f32 %v231_v9, 0.0 }
  0xe1   :  { %v103_v11 = vmax.f32 %v94_v10, 0.0 }
  0xe3   :  { %234 = vmatprep.mubr.msk.f32.mxu1 %vm106_vm1, %v103_v11 }
  0xe4   :  { %235 = vmatmul.mubr.msk.f32.vlgmr.msra.gmra.mrb[0].mxu1 %vm106_vm1, %v104_v12 }
 0x1b7   :  { %v236_v13 = vpop.f32.mrb[0].mxu1 }
 0x1b8   :  { %v189_v14 = vmax.f32 %v236_v13, 0.0  ;;  %v179_v15 = vpop.f32.mrb[1].mxu1 }
 0x1b9   :  { %v188_v16 = vmax.f32 %v179_v15, 0.0 }
 0x1ba   :  { %191 = vst.msk [vmem:[#allocation2 + $0x8] sm:$0xff] %vm21_vm0, %v189_v14 }
 0x1bb   :  { %190 = vst.msk [vmem:[#allocation2] sm:$0xff] %vm21_vm0, %v188_v16 }
 0x1bc   :  { %259 = shalt.err (!%p256_p4)
}
 0x1bd   :  { %s260_s28 = scalar_lea.hbm %s335_s3, 256 }
 0x1be   :  { %p261_p5 = scmp.ne.s32.totalorder %s335_s3, %s260_s28  ;;  %p264_p6 = scmp.lt.u32.totalorder %s260_s28, %s335_s3 }
 0x1c0   :  { %p266_p7 = pnand %p264_p6, %p261_p5 }
 0x1c2   :  { %269 = shalt.err (!%p266_p7)
}
 0x1c3   :  { %s273_s6 = smov 128   ;;  %s274_s7 = smov 8  }
 0x1c4   :  { %203 = dma.vmem_to_hbm [thread:$0]  %s198_s26, 256, %s335_s3, [#allocation3], %s273_s6, %s273_s6, %s274_s7  }
 0x1c5   :  { %270 = dma.done.wait [#allocation3], 256  }
 0x1c6   :  { %271 = vsyncadd [#allocation3], 4294967040 }
 0x1c7   :  { %207 = vsyncpa [#allocation3], 1 }

</bundles_post_ra>
